<compile_context>
chip_gen: v6e
topology: v6e:2x2x1
jax: 0.10.0
libtpu: 0.0.40
codegen_flags: <defaults>
</compile_context>

<pallas_src>
import functools
import math

import jax
import jax.numpy as jnp
from jax.experimental import pallas as pl
from jax.experimental.pallas import tpu as pltpu

_MIB = 1024 * 1024


def _l2norm_kernel(x_ref, o_ref, *, eps: float, hidden: int):
    xf = x_ref[...].astype(jnp.float32)
    # Normalize by the *true* hidden size: padded lanes (if any) are zeros and do not
    # contribute to the sum, so sum/hidden == mean over the real features.
    ssq = jnp.sum(xf * xf, axis=-1, keepdims=True)
    inv = jax.lax.rsqrt(ssq * (1.0 / float(hidden)) + eps)
    # Multiply in f32, cast once at the store (exactly the torch x.float() path).
    # Rows beyond the true row count in a ragged last block may compute garbage;
    # Pallas clips their stores so they never reach the returned array.
    o_ref[...] = (xf * inv).astype(o_ref.dtype)


def _vmem_capacity_bytes() -> int:
    """Physical VMEM per TensorCore; conservative (v7x, 64 MiB) fallback on failure."""
    try:
        info = pltpu.get_tpu_info()
        cap = getattr(info, "vmem_capacity_bytes", None)
        if cap:
            return int(cap)
    except Exception:
        pass
    return 64 * _MIB


def _dimension_semantics():
    """Core-parallel on multi-TensorCore chips (v7x) so both TCs issue DMAs for the
    row loop; plain parallel elsewhere. Falls back safely if the query is unavailable.
    # TODO(synk): on v7x, confirm in an xprof trace that both TCs stream; if the
    # per-chip core count is not exposed here, use an explicit leading grid axis of
    # size num_cores (or pl.core_map) instead."""
    try:
        info = pltpu.get_tpu_info()
        for attr in ("tensorcores_per_chip", "num_tensorcores_per_chip", "cores_per_chip"):
            n = getattr(info, attr, None)
            if n is not None and int(n) > 1:
                return (pltpu.CORE_PARALLEL,)
    except Exception:
        pass
    return (pltpu.PARALLEL,)


def _choose_row_tile(rows: int, hidden: int, itemsize: int, step_budget_bytes: int) -> int:
    """Largest sublane-packed row tile whose per-step VMEM charge fits the budget."""
    # Sublane packing: 8 rows/vreg for f32, 16 for bf16, 32 for int8/fp8.
    sublane = max(8, 32 // itemsize)
    # Per-element VMEM charge: double-buffered in + out (4*itemsize) plus up to two
    # f32 temps (x.float() and its square). This is deliberately conservative so the
    # block can never blow the scoped limit on v7x's 64 MiB VMEM.
    # TODO(synk): probe with a bundle dump / VMEM-OOM test; if the sum-of-squares
    # streams through vregs (likely), shrink toward 4*itemsize + 4 and give the
    # reclaimed budget to bigger streamed blocks.
    per_elem = 4 * itemsize + 8
    tile = step_budget_bytes // max(hidden * per_elem, 1)
    tile = max(sublane, (tile // sublane) * sublane)
    rows_rounded = -(-rows // sublane) * sublane
    return min(tile, rows_rounded)


def l2norm(
    x: jax.Array,
    eps: float = 1e-6,
    *,
    row_tile: int | None = None,
    input_buffering: int | None = None,
) -> jax.Array:
    """x: (..., hidden). Returns x * rsqrt(mean(x^2, -1) + eps) computed in f32 and
    cast back to x.dtype (identical to the PyTorch L2Norm forward)."""
    orig_shape = x.shape
    hidden = orig_shape[-1]
    rows = math.prod(orig_shape[:-1]) if len(orig_shape) > 1 else 1
    x2d = x.reshape(rows, hidden)

    # Lane-dense output: pad the feature axis to a multiple of 128 so stores are
    # unmasked vst (biggest measured lever for sub-128 lane widths). Padded lanes are
    # zero and the kernel normalizes by the true `hidden`, so results are unchanged.
    lane = 128
    pad = (-hidden) % lane
    if pad:
        x2d = jnp.pad(x2d, ((0, 0), (0, pad)))
    hidden_p = hidden + pad

    itemsize = jnp.dtype(x.dtype).itemsize

    # Device-aware budgets: scoped VMEM limit ~3/4 of physical (96 MiB on v5e/v6e,
    # 48 MiB on v7x); the streamed-data budget takes most of it with headroom left.
    vmem_cap = _vmem_capacity_bytes()
    vmem_limit = min((vmem_cap * 3) // 4, 96 * _MIB)
    step_budget = min(64 * _MIB, (vmem_limit * 5) // 6)

    if row_tile is None:
        row_tile = _choose_row_tile(rows, hidden_p, itemsize, step_budget)

    grid = (pl.cdiv(rows, row_tile),)

    in_spec_kwargs = {}
    if input_buffering is not None and input_buffering != 2:
        # Optional deeper input buffering; sweep only if small-step configs still
        # show exposed DMA after the tiling fix (costs VMEM).
        in_spec_kwargs["pipeline_mode"] = pl.Buffered(input_buffering)

    out2d = pl.pallas_call(
        functools.partial(_l2norm_kernel, eps=eps, hidden=hidden),
        out_shape=jax.ShapeDtypeStruct((rows, hidden_p), x.dtype),
        grid_spec=pltpu.PrefetchScalarGridSpec(
            num_scalar_prefetch=0,
            grid=grid,
            in_specs=[pl.BlockSpec((row_tile, hidden_p), lambda i: (i, 0), **in_spec_kwargs)],
            out_specs=pl.BlockSpec((row_tile, hidden_p), lambda i: (i, 0)),
        ),
        compiler_params=pltpu.CompilerParams(
            dimension_semantics=_dimension_semantics(),
            vmem_limit_bytes=vmem_limit,
        ),
        cost_estimate=pl.CostEstimate(
            flops=3 * rows * hidden,
            transcendentals=rows,
            bytes_accessed=2 * rows * hidden_p * itemsize,
        ),
    )(x2d)

    out2d = out2d[:, :hidden] if pad else out2d
    return out2d.reshape(orig_shape)


def l2norm_ref(x: jax.Array, eps: float = 1e-6) -> jax.Array:
    xf = x.astype(jnp.float32)
    return (xf * jax.lax.rsqrt(jnp.mean(xf * xf, axis=-1, keepdims=True) + eps)).astype(x.dtype)


if __name__ == "__main__":
    key = jax.random.PRNGKey(0)
    k0, k1, k2 = jax.random.split(key, 3)

    # Primary case: module-like shape (batch=2, seq=8, hidden=32), bf16 activations.
    x0 = jax.random.normal(k0, (2, 8, 32), dtype=jnp.bfloat16)
    out0 = jax.block_until_ready(l2norm(x0, eps=1e-6))
    ref0 = l2norm_ref(x0, eps=1e-6)
    assert out0.shape == x0.shape and out0.dtype == x0.dtype
    assert jnp.allclose(out0.astype(jnp.float32), ref0.astype(jnp.float32), atol=2e-2, rtol=2e-2)

    # Ragged row tail + hidden not a multiple of 128 (exercises pad + clip paths), f32.
    x1 = jax.random.normal(k1, (3, 5, 160), dtype=jnp.float32)
    out1 = jax.block_until_ready(l2norm(x1, eps=1e-6))
    ref1 = l2norm_ref(x1, eps=1e-6)
    assert out1.shape == x1.shape and out1.dtype == x1.dtype
    assert jnp.allclose(out1, ref1, atol=1e-5, rtol=1e-5)

    # Lane-dense hidden (multiple of 128), bf16.
    x2 = jax.random.normal(k2, (4, 7, 256), dtype=jnp.bfloat16)
    out2 = jax.block_until_ready(l2norm(x2, eps=1e-6))
    ref2 = l2norm_ref(x2, eps=1e-6)
    assert out2.shape == x2.shape and out2.dtype == x2.dtype
    assert jnp.allclose(out2.astype(jnp.float32), ref2.astype(jnp.float32), atol=2e-2, rtol=2e-2)

    print("KERNEL_OK")
</pallas_src>

<mosaic_0001>
module attributes {stable_mosaic.version = 11 : i64} {
  func.func @_l2norm_kernel(%arg0: i32, %arg1: memref<16x128xbf16, #tpu.memory_space<vmem>>, %arg2: memref<16x128xbf16, #tpu.memory_space<vmem>>) attributes {dimension_semantics = [#tpu.dimension_semantics<parallel>], iteration_bounds = array<i64: 1>, scalar_prefetch = 0 : i64, scratch_operands = 0 : i64, tpu.core_type = #tpu.core_type<tc>, window_params = [{transform_indices = @transform_0, window_bounds = array<i64: 16, 128>}, {transform_indices = @transform_1, window_bounds = array<i64: 16, 128>}]} {
    %c0 = arith.constant 0 : index
    %c0_0 = arith.constant 0 : index
    %0 = vector.load %arg1[%c0, %c0_0] : memref<16x128xbf16, #tpu.memory_space<vmem>>, vector<16x128xbf16>
    %1 = arith.extf %0 : vector<16x128xbf16> to vector<16x128xf32>
    %2 = arith.mulf %1, %1 : vector<16x128xf32>
    %cst = arith.constant dense<0.000000e+00> : vector<16xf32>
    %3 = vector.multi_reduction <add>, %2, %cst [1] : vector<16x128xf32> to vector<16xf32>
    %4 = vector.shape_cast %3 : vector<16xf32> to vector<16x1xf32>
    %cst_1 = arith.constant 3.125000e-02 : f32
    %5 = vector.broadcast %cst_1 : f32 to vector<16x1xf32>
    %6 = arith.mulf %4, %5 : vector<16x1xf32>
    %cst_2 = arith.constant 9.99999997E-7 : f32
    %7 = vector.broadcast %cst_2 : f32 to vector<16x1xf32>
    %8 = arith.addf %6, %7 : vector<16x1xf32>
    %9 = math.rsqrt %8 : vector<16x1xf32>
    %10 = vector.broadcast %9 : vector<16x1xf32> to vector<16x128xf32>
    %11 = arith.mulf %1, %10 : vector<16x128xf32>
    %12 = arith.truncf %11 : vector<16x128xf32> to vector<16x128xbf16>
    %c0_3 = arith.constant 0 : index
    %c0_4 = arith.constant 0 : index
    %13 = vector.load %arg2[%c0_3, %c0_4] : memref<16x128xbf16, #tpu.memory_space<vmem>>, vector<16x128xbf16>
    tpu.vector_store %arg2[%c0_3, %c0_4], %12 {strides = array<i32>} : memref<16x128xbf16, #tpu.memory_space<vmem>>, vector<16x128xbf16>,
    return
  }
  func.func @transform_0(%arg0: i32) -> (i32, i32) {
    %c0_i32 = arith.constant 0 : i32
    %c0_i32_0 = arith.constant 0 : i32
    return %arg0, %c0_i32 : i32, i32
  }
  func.func @transform_1(%arg0: i32) -> (i32, i32) {
    %c0_i32 = arith.constant 0 : i32
    %c0_i32_0 = arith.constant 0 : i32
    return %arg0, %c0_i32 : i32, i32
  }
}

</mosaic_0001>

<bundles_post_ra>
// kernel: tpu_custom_call.1
= control target key start
LH: loop header
LB: loop body
LE: loop exit
PB: predicated region body
PF: predicated region fallthrough
CT: control target
= control target key end

     0   :  { %6 = vsyncpa [#allocation3], 0  ;;  %s159_s0 = inlined_call_operand.hbm [shape: bf16[16,128], index: 0, kind: input, shape index: {}]   ;;  %s160_s1 = inlined_call_operand.hbm [shape: bf16[16,128], index: 1, kind: output, shape index: {}]  }
   0x1   :  { %7 = vsyncpa [#allocation4], 0  ;;  %s133_s6 = smov [#allocation2]  }
   0x2   :  { %s13_s7 = sshll.u32 %s133_s6, 4  ;;  %s14_s7 = int_to_ptr.vmem [resolvable:$true] %s13_s7 }
   0x3   :  { %s97_s8 = scalar_lea.vmem %s14_s7, 128  ;;  %p102_p1 = scmp.lt.s32.totalorder %s14_s7, %s14_s7 }
   0x4   :  { %p98_p0 = scmp.ne.s32.totalorder %s14_s7, %s97_s8  ;;  %p103_p2 = scmp.lt.s32.totalorder %s97_s8, %s97_s8 }
   0x6   :  { %p104_p3 = por %p103_p2, %p102_p1 }
   0x8   :  { %p105_p4 = pnand %p104_p3, %p98_p0 }
   0xa   :  { %108 = shalt.err (!%p105_p4)
}
   0xb   :  { %s134_s9 = smov 64   ;;  %s135_s10 = smov 4  }
   0xc   :  { %19 = dma.hbm_to_vmem [thread:$0]  %s159_s0, 128, %s14_s7, [#allocation3], %s134_s9, %s134_s9, %s135_s10  }
   0xd   :  { %129 = dma.done.wait [#allocation3], 128  }
   0xe   :  { %130 = vsyncadd [#allocation3], 4294967168  ;;  %v73_v0 = vld [vmem:[#allocation2] sm:$0xff]   ;;  %s136_s0 = smov [#allocation5]  }
   0xf   :  { %v74_v1 = vunpack.c.l.bf16 %v73_v0  ;;  %v75_v2 = vunpack.c.h.bf16 %v73_v0  ;;  %s56_s13 = sshll.u32 %s136_s0, 4  ;;  %s57_s13 = int_to_ptr.vmem [resolvable:$true] %s56_s13 }
  0x10   :  { %s109_s14 = scalar_lea.vmem %s57_s13, 128  ;;  %p114_p6 = scmp.lt.s32.totalorder %s57_s13, %s57_s13 }
  0x11   :  { %v27_v3 = vmul.f32 %v74_v1, %v74_v1  ;;  %v28_v4 = vmul.f32 %v75_v2, %v75_v2  ;;  %p110_p5 = scmp.ne.s32.totalorder %s57_s13, %s109_s14  ;;  %p115_p7 = scmp.lt.s32.totalorder %s109_s14, %s109_s14 }
  0x13   :  { %29 = vadd.xlane.f32.xlu0 %v27_v3  ;;  %p116_p8 = por %p115_p7, %p114_p6 }
  0x15   :  { %p117_p9 = pnand %p116_p8, %p110_p5 }
  0x17   :  { %31 = vadd.xlane.f32.xlu0 %v28_v4 }
  0x9c   :  { %v30_v5 = vpop.xlane.xlu0 %29 }
  0x9d   :  { %v33_v6 = vmul.f32 0.03125, %v30_v5 }
  0x9f   :  { %v35_v7 = vadd.f32 1e-06, %v33_v6 }
  0xa0   :  { %v32_v8 = vpop.xlane.xlu0 %31 }
  0xa1   :  { %v34_v9 = vmul.f32 0.03125, %v32_v8  ;;  %85 = vrsqrt.f32 %v35_v7 }
  0xa3   :  { %v36_v10 = vadd.f32 1e-06, %v34_v9 }
  0xa5   :  { %87 = vrsqrt.f32 %v36_v10 }
  0xae   :  { %v86_v11 = vpop.eup %85 }
  0xaf   :  { %v39_v13 = vmul.f32 %v86_v11, %v74_v1 }
  0xb2   :  { %v88_v12 = vpop.eup %87 }
  0xb3   :  { %v40_v14 = vmul.f32 %v88_v12, %v75_v2 }
  0xb5   :  { %v79_v15 = vpack.c.bf16 %v40_v14, %v39_v13 }
  0xb7   :  { %80 = vst [vmem:[#allocation5] sm:$0xff] %v79_v15  }
  0xb8   :  { %120 = shalt.err (!%p117_p9)
}
  0xb9   :  { %62 = dma.vmem_to_hbm [thread:$0]  %s57_s13, 128, %s160_s1, [#allocation4], %s134_s9, %s134_s9, %s135_s10  }
  0xba   :  { %131 = dma.done.wait [#allocation4], 128  }
  0xbb   :  { %132 = vsyncadd [#allocation4], 4294967168 }
  0xbc   :  { %66 = vsyncpa [#allocation3], 1 }
  0xbd   :  { %67 = vsyncpa [#allocation4], 1 }

</bundles_post_ra>
